<compile_context>
chip_gen: v7x
topology: tpu7x:2x2x1
jax: 0.10.0
libtpu: 0.0.40
codegen_flags: <defaults>
</compile_context>

<pallas_src>
import functools

import jax
import jax.numpy as jnp
from jax.experimental import pallas as pl
from jax.experimental.pallas import tpu as pltpu


def _round_up(x, m):
    return ((x + m - 1) // m) * m


def _vmem_capacity_bytes():
    """Physical VMEM per TensorCore; conservative fallback if the query fails."""
    try:
        info = pltpu.get_tpu_info()
        cap = getattr(info, "vmem_capacity_bytes", None)
        if cap:
            return int(cap)
    except Exception:
        pass
    return 64 * 1024 * 1024  # v7x has the smallest VMEM -> safe default


def pad_ffn_weights(w1, b1, w2, *, tile_ff):
    """One-time (init-time) zero-padding of d_ff to a multiple of tile_ff.

    Call this once when the model is built if you intend to use the chunked-d_ff
    path, so the per-call wrapper never pays an HBM read+write of W1/W2.
    relu(0 + 0) = 0 feeds zero rows of W2 -> padded columns contribute nothing.
    """
    d_ff = w1.shape[1]
    dff_pad = _round_up(d_ff, tile_ff)
    if dff_pad == d_ff:
        return w1, b1, w2
    return (jnp.pad(w1, ((0, 0), (0, dff_pad - d_ff))),
            jnp.pad(b1, (0, dff_pad - d_ff)),
            jnp.pad(w2, ((0, dff_pad - d_ff), (0, 0))))


# ----------------------------- kernel bodies -----------------------------

def _ffn_resident_kernel(x_ref, w1_ref, b1_ref, w2_ref, b2_ref, g_ref, beta_ref,
                         o_ref, *, eps):
    """Full-d_ff body: weights are VMEM-resident across all row tiles."""
    x = x_ref[...]                                                    # (TM, d_model)
    h = jnp.dot(x, w1_ref[...], preferred_element_type=jnp.float32)  # (TM, d_ff)
    h = jnp.maximum(h + b1_ref[...].astype(jnp.float32), 0.0)
    # dropout(p=0.0) is the identity in both train and eval -> no-op.
    y = jnp.dot(h.astype(w2_ref.dtype), w2_ref[...],
                preferred_element_type=jnp.float32)                   # (TM, d_model)
    y = y + b2_ref[...].astype(jnp.float32) + x.astype(jnp.float32)
    mean = jnp.mean(y, axis=-1, keepdims=True)
    c = y - mean
    var = jnp.mean(c * c, axis=-1, keepdims=True)
    inv = jax.lax.rsqrt(var + eps)
    out = c * inv * g_ref[...].astype(jnp.float32) + beta_ref[...].astype(jnp.float32)
    o_ref[...] = out.astype(o_ref.dtype)


def _ffn_chunked_kernel(x_ref, w1_ref, b1_ref, w2_ref, b2_ref, g_ref, beta_ref,
                        o_ref, acc_ref, *, eps):
    """Chunked-d_ff body: f32 accumulator over the trailing 'arbitrary' axis."""
    kf = pl.program_id(1)

    @pl.when(kf == 0)
    def _():
        acc_ref[...] = jnp.zeros_like(acc_ref)

    x = x_ref[...]                                                    # (TM, d_model)
    h = jnp.dot(x, w1_ref[...], preferred_element_type=jnp.float32)  # (TM, tile_ff)
    h = jnp.maximum(h + b1_ref[...].astype(jnp.float32), 0.0)
    acc_ref[...] += jnp.dot(h.astype(w2_ref.dtype), w2_ref[...],
                            preferred_element_type=jnp.float32)

    @pl.when(kf == pl.num_programs(1) - 1)
    def _():
        y = acc_ref[...] + b2_ref[...].astype(jnp.float32) + x.astype(jnp.float32)
        mean = jnp.mean(y, axis=-1, keepdims=True)
        c = y - mean
        var = jnp.mean(c * c, axis=-1, keepdims=True)
        inv = jax.lax.rsqrt(var + eps)
        out = c * inv * g_ref[...].astype(jnp.float32) + beta_ref[...].astype(jnp.float32)
        o_ref[...] = out.astype(o_ref.dtype)


# ------------------------------- wrapper ---------------------------------

def _resident_need_bytes(tile_m, d_model, d_ff, dt):
    return (2 * 2 * tile_m * d_model * dt          # x + out tiles (double-buffered)
            + 2 * 2 * d_model * d_ff * dt          # W1 + W2 (conservatively 2 bufs)
            + tile_m * d_ff * (4 + dt)             # f32 h + model-dtype cast copy
            + (2 << 20))                           # biases / headroom


def _chunked_need_bytes(tile_m, tile_ff, d_model, dt):
    return (2 * 2 * tile_m * d_model * dt          # x + out tiles (double-buffered)
            + 2 * 2 * tile_ff * d_model * dt       # W1 + W2 chunks (double-buffered)
            + 4 * tile_m * d_model                 # f32 accumulator
            + tile_m * tile_ff * (4 + dt)          # f32 h + cast copy
            + (2 << 20))                           # biases / headroom


def feed_forward_pallas(x, w1, b1, w2, b2, gamma, beta, *,
                        eps=1e-5, tile_m=512, tile_ff=1024,
                        force_chunked=False, vmem_budget_bytes=None):
    """x: [B, S, d_model]; w1: [d_model, d_ff]; w2: [d_ff, d_model]."""
    B, S, d_model = x.shape
    d_ff = w1.shape[1]
    M = B * S
    dt = jnp.dtype(x.dtype).itemsize

    if vmem_budget_bytes is None:
        vmem_budget_bytes = int(0.7 * _vmem_capacity_bytes())

    # ---- row tiling: big tiles feed the MXU; clamp for tiny inputs ----
    sub = 16 if x.dtype == jnp.bfloat16 else 8      # sublane packing granularity
    m_aligned = _round_up(M, sub)
    tile_m = min(tile_m, m_aligned)
    # Keep >= 2 row blocks whenever M allows: the leading 'parallel' axis is what
    # gets sharded across the 2 TensorCores on v7x megacore.
    if m_aligned >= 2 * sub:
        tile_m = min(tile_m, _round_up(-(-M // 2), sub))
    tile_m = max(sub, tile_m)

    # ---- path selection from the VMEM budget ----
    use_resident = (not force_chunked) and (
        _resident_need_bytes(tile_m, d_model, d_ff, dt) <= vmem_budget_bytes)

    b1_2d = b1.reshape(1, d_ff)
    b2_2d = b2.reshape(1, d_model)
    g_2d = gamma.reshape(1, d_model)
    beta_2d = beta.reshape(1, d_model)

    x2d = x.reshape(M, d_model)
    M_pad = _round_up(M, tile_m)
    if M_pad != M:
        x2d = jnp.pad(x2d, ((0, M_pad - M), (0, 0)))

    if use_resident:
        need = _resident_need_bytes(tile_m, d_model, d_ff, dt)
        vmem_limit = int(min(vmem_budget_bytes, max(16 << 20, need + (4 << 20))))
        out2d = pl.pallas_call(
            functools.partial(_ffn_resident_kernel, eps=eps),
            out_shape=jax.ShapeDtypeStruct((M_pad, d_model), x.dtype),
            grid_spec=pltpu.PrefetchScalarGridSpec(
                num_scalar_prefetch=0,
                grid=(M_pad // tile_m,),
                in_specs=[
                    pl.BlockSpec((tile_m, d_model), lambda i: (i, 0)),   # x rows
                    pl.BlockSpec((d_model, d_ff), lambda i: (0, 0)),     # W1 (resident)
                    pl.BlockSpec((1, d_ff), lambda i: (0, 0)),           # b1
                    pl.BlockSpec((d_ff, d_model), lambda i: (0, 0)),     # W2 (resident)
                    pl.BlockSpec((1, d_model), lambda i: (0, 0)),        # b2
                    pl.BlockSpec((1, d_model), lambda i: (0, 0)),        # gamma
                    pl.BlockSpec((1, d_model), lambda i: (0, 0)),        # beta
                ],
                out_specs=pl.BlockSpec((tile_m, d_model), lambda i: (i, 0)),
            ),
            compiler_params=pltpu.CompilerParams(
                dimension_semantics=("parallel",),
                vmem_limit_bytes=vmem_limit,
            ),
        )(x2d, w1, b1_2d, w2, b2_2d, g_2d, beta_2d)
        return out2d[:M].reshape(B, S, d_model)

    # ---- chunked d_ff path (weights too big to keep resident, e.g. v7x / huge d_ff) ----
    lane = 128
    # Multiples of 256 preferred on v6e/v7x (256-wide MXU); 128 is the hard minimum.
    tile_ff = max(lane, min(_round_up(tile_ff, lane), _round_up(d_ff, lane)))
    # Shrink tiles until the working set fits the per-generation budget.
    while (_chunked_need_bytes(tile_m, tile_ff, d_model, dt) > vmem_budget_bytes
           and tile_ff > 256):
        tile_ff = max(256, tile_ff // 2)
    while (_chunked_need_bytes(tile_m, tile_ff, d_model, dt) > vmem_budget_bytes
           and tile_m > max(sub, 128)):
        tile_m = max(max(sub, 128), _round_up(tile_m // 2, sub))

    dff_pad = _round_up(d_ff, tile_ff)
    if dff_pad != d_ff:
        # TODO(synk): for production, pre-pad once at init via pad_ffn_weights()
        # so this per-call HBM copy of W1/W2 never happens.
        w1, b1, w2 = pad_ffn_weights(w1, b1, w2, tile_ff=tile_ff)
    b1_2d = b1.reshape(1, dff_pad)

    need = _chunked_need_bytes(tile_m, tile_ff, d_model, dt)
    vmem_limit = int(min(vmem_budget_bytes, max(16 << 20, need + (4 << 20))))

    grid = (M_pad // tile_m, dff_pad // tile_ff)
    out2d = pl.pallas_call(
        functools.partial(_ffn_chunked_kernel, eps=eps),
        out_shape=jax.ShapeDtypeStruct((M_pad, d_model), x.dtype),
        grid_spec=pltpu.PrefetchScalarGridSpec(
            num_scalar_prefetch=0,
            grid=grid,
            in_specs=[
                pl.BlockSpec((tile_m, d_model), lambda i, k: (i, 0)),    # x rows
                pl.BlockSpec((d_model, tile_ff), lambda i, k: (0, k)),   # W1 chunk
                pl.BlockSpec((1, tile_ff), lambda i, k: (0, k)),         # b1 chunk
                pl.BlockSpec((tile_ff, d_model), lambda i, k: (k, 0)),   # W2 chunk
                pl.BlockSpec((1, d_model), lambda i, k: (0, 0)),         # b2
                pl.BlockSpec((1, d_model), lambda i, k: (0, 0)),         # gamma
                pl.BlockSpec((1, d_model), lambda i, k: (0, 0)),         # beta
            ],
            out_specs=pl.BlockSpec((tile_m, d_model), lambda i, k: (i, 0)),
            scratch_shapes=[pltpu.VMEM((tile_m, d_model), jnp.float32)],
        ),
        compiler_params=pltpu.CompilerParams(
            dimension_semantics=("parallel", "arbitrary"),
            vmem_limit_bytes=vmem_limit,
        ),
    )(x2d, w1, b1_2d, w2, b2_2d, g_2d, beta_2d)

    return out2d[:M].reshape(B, S, d_model)


def feed_forward_ref(x, w1, b1, w2, b2, gamma, beta, eps=1e-5):
    h = jnp.maximum(x @ w1 + b1, 0.0)
    y = h @ w2 + b2 + x
    mean = jnp.mean(y, axis=-1, keepdims=True)
    var = jnp.mean((y - mean) ** 2, axis=-1, keepdims=True)
    return (y - mean) * jax.lax.rsqrt(var + eps) * gamma + beta


if __name__ == "__main__":
    # Small shapes consistent with the module: batch=2, seq=8, d_model=128, d_ff=256.
    B, S, d_model, d_ff = 2, 8, 128, 256

    key = jax.random.PRNGKey(0)
    kx, k1, kb1, k2, kb2 = jax.random.split(key, 5)

    x = jax.random.normal(kx, (B, S, d_model), dtype=jnp.float32)

    # Deterministic parameter init (Kaiming-uniform-ish scale, like nn.Linear)
    lim1 = 1.0 / (d_model ** 0.5)
    lim2 = 1.0 / (d_ff ** 0.5)
    w1 = jax.random.uniform(k1, (d_model, d_ff), minval=-lim1, maxval=lim1, dtype=jnp.float32)
    b1 = jax.random.uniform(kb1, (d_ff,), minval=-lim1, maxval=lim1, dtype=jnp.float32)
    w2 = jax.random.uniform(k2, (d_ff, d_model), minval=-lim2, maxval=lim2, dtype=jnp.float32)
    b2 = jax.random.uniform(kb2, (d_model,), minval=-lim2, maxval=lim2, dtype=jnp.float32)
    gamma = jnp.ones((d_model,), dtype=jnp.float32)   # LayerNorm weight init
    beta = jnp.zeros((d_model,), dtype=jnp.float32)   # LayerNorm bias init

    ref = feed_forward_ref(x, w1, b1, w2, b2, gamma, beta)

    # Default path: weights fully VMEM-resident, single parallel row-tile axis.
    out_res = feed_forward_pallas(x, w1, b1, w2, b2, gamma, beta)
    out_res = jax.block_until_ready(out_res)
    assert out_res.shape == (B, S, d_model)
    assert jnp.allclose(out_res, ref, atol=1e-5, rtol=1e-5), "resident path mismatch"

    # Also exercise the chunked-d_ff accumulation path (used for big d_ff / v7x VMEM).
    out_chk = feed_forward_pallas(x, w1, b1, w2, b2, gamma, beta,
                                  force_chunked=True, tile_ff=128)
    out_chk = jax.block_until_ready(out_chk)
    assert jnp.allclose(out_chk, ref, atol=1e-5, rtol=1e-5), "chunked path mismatch"

    print("KERNEL_OK")
</pallas_src>

<mosaic_0001>
module attributes {stable_mosaic.version = 11 : i64} {
  func.func @_ffn_resident_kernel(%arg0: i32, %arg1: memref<8x128xf32, #tpu.memory_space<vmem>>, %arg2: memref<128x256xf32, #tpu.memory_space<vmem>>, %arg3: memref<1x256xf32, #tpu.memory_space<vmem>>, %arg4: memref<256x128xf32, #tpu.memory_space<vmem>>, %arg5: memref<1x128xf32, #tpu.memory_space<vmem>>, %arg6: memref<1x128xf32, #tpu.memory_space<vmem>>, %arg7: memref<1x128xf32, #tpu.memory_space<vmem>>, %arg8: memref<8x128xf32, #tpu.memory_space<vmem>>) attributes {dimension_semantics = [#tpu.dimension_semantics<parallel>], iteration_bounds = array<i64: 2>, scalar_prefetch = 0 : i64, scratch_operands = 0 : i64, tpu.core_type = #tpu.core_type<tc>, window_params = [{transform_indices = @transform_0, window_bounds = array<i64: 8, 128>}, {pipeline_mode = #tpu.pipeline_mode<synchronous>, transform_indices = @transform_1, window_bounds = array<i64: 128, 256>}, {pipeline_mode = #tpu.pipeline_mode<synchronous>, transform_indices = @transform_2, window_bounds = array<i64: 1, 256>}, {pipeline_mode = #tpu.pipeline_mode<synchronous>, transform_indices = @transform_3, window_bounds = array<i64: 256, 128>}, {pipeline_mode = #tpu.pipeline_mode<synchronous>, transform_indices = @transform_4, window_bounds = array<i64: 1, 128>}, {pipeline_mode = #tpu.pipeline_mode<synchronous>, transform_indices = @transform_5, window_bounds = array<i64: 1, 128>}, {pipeline_mode = #tpu.pipeline_mode<synchronous>, transform_indices = @transform_6, window_bounds = array<i64: 1, 128>}, {transform_indices = @transform_7, window_bounds = array<i64: 8, 128>}]} {
    %c0 = arith.constant 0 : index
    %c0_0 = arith.constant 0 : index
    %0 = vector.load %arg1[%c0, %c0_0] : memref<8x128xf32, #tpu.memory_space<vmem>>, vector<8x128xf32>
    %c0_1 = arith.constant 0 : index
    %c0_2 = arith.constant 0 : index
    %1 = vector.load %arg2[%c0_1, %c0_2] : memref<128x256xf32, #tpu.memory_space<vmem>>, vector<128x256xf32>
    %cst = arith.constant dense<0.000000e+00> : vector<8x256xf32>
    %2 = tpu.matmul %0, %1, %cst {dimension_numbers = #tpu.dot_dimension_numbers<[1], [0], [0], [1], [0, 0, 1, 1], [], []>} : vector<8x128xf32>, vector<128x256xf32>, vector<8x256xf32> -> vector<8x256xf32>
    %c0_3 = arith.constant 0 : index
    %c0_4 = arith.constant 0 : index
    %3 = vector.load %arg3[%c0_3, %c0_4] : memref<1x256xf32, #tpu.memory_space<vmem>>, vector<1x256xf32>
    %4 = vector.broadcast %3 : vector<1x256xf32> to vector<8x256xf32>
    %5 = arith.addf %2, %4 : vector<8x256xf32>
    %cst_5 = arith.constant 0.000000e+00 : f32
    %6 = vector.broadcast %cst_5 : f32 to vector<8x256xf32>
    %7 = arith.maximumf %5, %6 : vector<8x256xf32>
    %c0_6 = arith.constant 0 : index
    %c0_7 = arith.constant 0 : index
    %8 = vector.load %arg4[%c0_6, %c0_7] : memref<256x128xf32, #tpu.memory_space<vmem>>, vector<256x128xf32>
    %cst_8 = arith.constant dense<0.000000e+00> : vector<8x128xf32>
    %9 = tpu.matmul %7, %8, %cst_8 {dimension_numbers = #tpu.dot_dimension_numbers<[1], [0], [0], [1], [0, 0, 1, 1], [], []>} : vector<8x256xf32>, vector<256x128xf32>, vector<8x128xf32> -> vector<8x128xf32>
    %c0_9 = arith.constant 0 : index
    %c0_10 = arith.constant 0 : index
    %10 = vector.load %arg5[%c0_9, %c0_10] : memref<1x128xf32, #tpu.memory_space<vmem>>, vector<1x128xf32>
    %11 = vector.broadcast %10 : vector<1x128xf32> to vector<8x128xf32>
    %12 = arith.addf %9, %11 : vector<8x128xf32>
    %13 = arith.addf %12, %0 : vector<8x128xf32>
    %cst_11 = arith.constant dense<0.000000e+00> : vector<8xf32>
    %14 = vector.multi_reduction <add>, %13, %cst_11 [1] : vector<8x128xf32> to vector<8xf32>
    %15 = vector.shape_cast %14 : vector<8xf32> to vector<8x1xf32>
    %cst_12 = arith.constant 1.280000e+02 : f32
    %16 = vector.broadcast %cst_12 : f32 to vector<8x1xf32>
    %17 = arith.divf %15, %16 : vector<8x1xf32>
    %18 = vector.broadcast %17 : vector<8x1xf32> to vector<8x128xf32>
    %19 = arith.subf %13, %18 : vector<8x128xf32>
    %20 = arith.mulf %19, %19 : vector<8x128xf32>
    %cst_13 = arith.constant dense<0.000000e+00> : vector<8xf32>
    %21 = vector.multi_reduction <add>, %20, %cst_13 [1] : vector<8x128xf32> to vector<8xf32>
    %22 = vector.shape_cast %21 : vector<8xf32> to vector<8x1xf32>
    %cst_14 = arith.constant 1.280000e+02 : f32
    %23 = vector.broadcast %cst_14 : f32 to vector<8x1xf32>
    %24 = arith.divf %22, %23 : vector<8x1xf32>
    %cst_15 = arith.constant 9.99999974E-6 : f32
    %25 = vector.broadcast %cst_15 : f32 to vector<8x1xf32>
    %26 = arith.addf %24, %25 : vector<8x1xf32>
    %27 = math.rsqrt %26 : vector<8x1xf32>
    %28 = vector.broadcast %27 : vector<8x1xf32> to vector<8x128xf32>
    %29 = arith.mulf %19, %28 : vector<8x128xf32>
    %c0_16 = arith.constant 0 : index
    %c0_17 = arith.constant 0 : index
    %30 = vector.load %arg6[%c0_16, %c0_17] : memref<1x128xf32, #tpu.memory_space<vmem>>, vector<1x128xf32>
    %31 = vector.broadcast %30 : vector<1x128xf32> to vector<8x128xf32>
    %32 = arith.mulf %29, %31 : vector<8x128xf32>
    %c0_18 = arith.constant 0 : index
    %c0_19 = arith.constant 0 : index
    %33 = vector.load %arg7[%c0_18, %c0_19] : memref<1x128xf32, #tpu.memory_space<vmem>>, vector<1x128xf32>
    %34 = vector.broadcast %33 : vector<1x128xf32> to vector<8x128xf32>
    %35 = arith.addf %32, %34 : vector<8x128xf32>
    %c0_20 = arith.constant 0 : index
    %c0_21 = arith.constant 0 : index
    %36 = vector.load %arg8[%c0_20, %c0_21] : memref<8x128xf32, #tpu.memory_space<vmem>>, vector<8x128xf32>
    tpu.vector_store %arg8[%c0_20, %c0_21], %35 {strides = array<i32>} : memref<8x128xf32, #tpu.memory_space<vmem>>, vector<8x128xf32>,
    return
  }
  func.func @transform_0(%arg0: i32) -> (i32, i32) {
    %c0_i32 = arith.constant 0 : i32
    %c0_i32_0 = arith.constant 0 : i32
    return %arg0, %c0_i32 : i32, i32
  }
  func.func @transform_1(%arg0: i32) -> (i32, i32) {
    %c0_i32 = arith.constant 0 : i32
    %c0_i32_0 = arith.constant 0 : i32
    %c0_i32_1 = arith.constant 0 : i32
    return %c0_i32, %c0_i32_0 : i32, i32
  }
  func.func @transform_2(%arg0: i32) -> (i32, i32) {
    %c0_i32 = arith.constant 0 : i32
    %c0_i32_0 = arith.constant 0 : i32
    %c0_i32_1 = arith.constant 0 : i32
    return %c0_i32, %c0_i32_0 : i32, i32
  }
  func.func @transform_3(%arg0: i32) -> (i32, i32) {
    %c0_i32 = arith.constant 0 : i32
    %c0_i32_0 = arith.constant 0 : i32
    %c0_i32_1 = arith.constant 0 : i32
    return %c0_i32, %c0_i32_0 : i32, i32
  }
  func.func @transform_4(%arg0: i32) -> (i32, i32) {
    %c0_i32 = arith.constant 0 : i32
    %c0_i32_0 = arith.constant 0 : i32
    %c0_i32_1 = arith.constant 0 : i32
    return %c0_i32, %c0_i32_0 : i32, i32
  }
  func.func @transform_5(%arg0: i32) -> (i32, i32) {
    %c0_i32 = arith.constant 0 : i32
    %c0_i32_0 = arith.constant 0 : i32
    %c0_i32_1 = arith.constant 0 : i32
    return %c0_i32, %c0_i32_0 : i32, i32
  }
  func.func @transform_6(%arg0: i32) -> (i32, i32) {
    %c0_i32 = arith.constant 0 : i32
    %c0_i32_0 = arith.constant 0 : i32
    %c0_i32_1 = arith.constant 0 : i32
    return %c0_i32, %c0_i32_0 : i32, i32
  }
  func.func @transform_7(%arg0: i32) -> (i32, i32) {
    %c0_i32 = arith.constant 0 : i32
    %c0_i32_0 = arith.constant 0 : i32
    return %arg0, %c0_i32 : i32, i32
  }
}

</mosaic_0001>

<bundles_post_ra>
// kernel: tpu_custom_call.1
= control target key start
LH: loop header
LB: loop body
LE: loop exit
PB: predicated region body
PF: predicated region fallthrough
CT: control target
= control target key end

     0   :  { %12 = vsyncpa [#allocation3], 0  ;;  %s1330_s0 = inlined_call_operand.hbm [shape: f32[16,128], index: 0, kind: input, shape index: {}]   ;;  %s1331_s1 = inlined_call_operand.hbm [shape: f32[128,256], index: 1, kind: input, shape index: {}]   ;;  %s1332_s2 = inlined_call_operand.vmem [shape: f32[1,256], index: 2, kind: input, shape index: {}]   ;;  %s1333_s3 = inlined_call_operand.hbm [shape: f32[256,128], index: 3, kind: input, shape index: {}]   ;;  %s1334_s4 = inlined_call_operand.vmem [shape: f32[1,128], index: 4, kind: input, shape index: {}]   ;;  %s1335_s5 = inlined_call_operand.vmem [shape: f32[1,128], index: 5, kind: input, shape index: {}]   ;;  %s1336_s6 = inlined_call_operand.vmem [shape: f32[1,128], index: 6, kind: input, shape index: {}]   ;;  %s1337_s7 = inlined_call_operand.hbm [shape: f32[16,128], index: 7, kind: output, shape index: {}]  }
   0x1   :  { %14 = vsyncpa [#allocation3 + $0x1], 0 }
   0x2   :  { %15 = vsyncpa [#allocation6], 0 }
   0x3   :  { %16 = vsyncpa [#allocation4], 0 }
   0x4   :  { %18 = vsyncpa [#allocation4 + $0x1], 0  ;;  %s1082_s24 = smov 0   ;;  %s1084_s25 = smov 0  }
   0x5   :  { %s1086_s26 = smov 0   ;;  %s1088_s27 = smov 0  }
   0x6 LB: > { %s1103_s28 = sadd.s32 4294967295, %s1031_s27   ;;  %s683_s29 = sadd.s32 4294967294, %s1031_s27   ;;  %s1031_s27 = sphi %s1088_s27, %s1357_s27   ;;  %s1027_s26 = sphi %s1086_s26, %s1356_s26   ;;  %s1023_s25 = sphi %s1084_s25, %s1355_s25   ;;  %s1019_s24 = sphi %s1082_s24, %s1354_s24  }
   0x7   : > { %p44_p0 = scmp.ne.s32.totalorder %s1023_s25, %s1019_s24  ;;  %p1338_p1 = scmp.eq.s32.totalorder %s1103_s28, 0 }
   0x8   : > { %p200_p3 = scmp.eq.s32.totalorder %s683_s29, 1  ;;  %p684_p5 = scmp.ge.s32.totalorder %s1031_s27, 1 }
   0x9   : > { %p1112_p4 = por %p1338_p1, %p44_p0  ;;  %p207_p7 = scmp.lt.s32.totalorder %s1031_s27, 3 }
   0xa   : > { %p1117_p6 = por %p200_p3, %p44_p0  ;;  %s1033_s10 = smov [#allocation5]  }
   0xb   : > { %s1341_s30 = scalar_select %p1112_p4, 1, 0 }
   0xc   : > { %s1342_s8 = scalar_select %p1117_p6, 1, 0 }
   0xd   : > { %p1122_p8 = pnand %p684_p5, %p207_p7  ;;  %s219_s11 = sshll.u32 %s1033_s10, 4  ;;  %s1126_s11 = int_to_ptr.vmem [resolvable:$true] %s219_s11 }
   0xe   : > { %s1034_s13 = smov [#allocation7]   ;;  %s875_s17 = scalar_lea.hbm %s1331_s1, 4096 }
   0xf   : > { %p813_p9 = pneg %p1122_p8  ;;  %s235_s14 = sshll.u32 %s1034_s13, 4  ;;  %s1137_s14 = int_to_ptr.vmem [resolvable:$true] %s235_s14 }
  0x10   : > { %p876_p12 = scmp.ne.s32.totalorder %s1331_s1, %s875_s17  ;;  %p882_p5 = scmp.lt.u32.totalorder %s875_s17, %s1331_s1 }
  0x11   : > { %p1133_p11 = pnand %p813_p9, %p1338_p1 }
  0x13   : > { %p877_p13 = pneg %p1133_p11 }
  0x15   : > { %p878_p0 = pnand %p877_p13, %p876_p12 }
  0x17   : > { %p879_p3 = pneg %p878_p0 }
  0x19   : > { %p884_p7 = pnand %p882_p5, %p879_p3 }
  0x1b   : > { %887 = shalt.err (!%p884_p7)
}
  0x1c   : > { %s888_s22 = scalar_lea.vmem %s1126_s11, 4096  ;;  %p896_p2 = scmp.lt.s32.totalorder %s1126_s11, %s1126_s11 }
  0x1d   : > { %p889_p9 = scmp.ne.s32.totalorder %s1126_s11, %s888_s22  ;;  %p897_p12 = scmp.lt.s32.totalorder %s888_s22, %s888_s22 }
  0x1f   : > { %p891_p10 = pnand %p889_p9, %p877_p13  ;;  %p898_p0 = por %p897_p12, %p896_p2 }
  0x21   : > { %p892_p1 = pneg %p891_p10 }
  0x23   : > { %p899_p6 = pnand %p898_p0, %p892_p1 }
  0x25   : > { %902 = shalt.err (!%p899_p6)
}
  0x26   : > { %s1035_s23 = smov 256   ;;  %s1036_s29 = smov 16  }
  0x27   : > { %816 = dma.hbm_to_vmem [thread:$0]  (!%p1133_p11), %s1331_s1, 4096, %s1126_s11, [#allocation6], %s1035_s23, %s1035_s23, %s1036_s29  }
  0x28   : > { %s903_s17 = scalar_lea.hbm %s1333_s3, 4096 }
  0x29   : > { %p904_p2 = scmp.ne.s32.totalorder %s1333_s3, %s903_s17  ;;  %p910_p10 = scmp.lt.u32.totalorder %s903_s17, %s1333_s3 }
  0x2b   : > { %p906_p1 = pnand %p904_p2, %p877_p13 }
  0x2d   : > { %p907_p6 = pneg %p906_p1 }
  0x2f   : > { %p912_p3 = pnand %p910_p10, %p907_p6 }
  0x31   : > { %915 = shalt.err (!%p912_p3)
}
  0x32   : > { %s916_s11 = scalar_lea.vmem %s1137_s14, 4096  ;;  %p924_p12 = scmp.lt.s32.totalorder %s1137_s14, %s1137_s14 }
  0x33   : > { %p917_p5 = scmp.ne.s32.totalorder %s1137_s14, %s916_s11  ;;  %p925_p0 = scmp.lt.s32.totalorder %s916_s11, %s916_s11 }
  0x35   : > { %p919_p7 = pnand %p917_p5, %p877_p13  ;;  %p926_p2 = por %p925_p0, %p924_p12 }
  0x37   : > { %p920_p9 = pneg %p919_p7 }
  0x39   : > { %p927_p1 = pnand %p926_p2, %p920_p9 }
  0x3b   : > { %930 = shalt.err (!%p927_p1)
}
  0x3c   : > { %s1037_s22 = smov 128   ;;  %s1038_s23 = smov 8  }
  0x3d   : > { %819 = dma.hbm_to_vmem [thread:$0]  (!%p1133_p11), %s1333_s3, 4096, %s1137_s14, [#allocation6], %s1037_s22, %s1037_s22, %s1038_s23  }
  0x3e   : > { %s1192_s13 = sadd.s32 1, %s1031_s27   ;;  %s31_s16 = sadd.s32 1, %s1027_s26 }
  0x3f   : > { %s28_s15 = ssub.s32 %s1031_s27, %s1192_s13  ;;  %p38_p6 = scmp.ne.s32.totalorder %s1027_s26, %s1023_s25 }
  0x40   : > { %p29_p13 = scmp.eq.s32.totalorder %s28_s15, 0  ;;  %p39_p10 = scmp.eq.s32.totalorder %s1031_s27, 0 }
  0x41   : > { %p1345_p5 = scmp.eq.s32.totalorder %s1103_s28, 1  ;;  %p830_p9 = scmp.lt.s32.totalorder %s1031_s27, 2 }
  0x42   : > { %s1201_s17 = scalar_select %p29_p13, %s1027_s26, %s31_s16  }
  0x43   : > { %p40_p3 = por %p39_p10, %p38_p6  ;;  %p1205_p7 = por %p1345_p5, %p38_p6 }
  0x44   : > { %s258_s12 = sand.u32 1, %s1027_s26   ;;  %s689_s14 = sshll.u32 %s1031_s27, 7 }
  0x45   : > { %s1346_s18 = scalar_select %p1205_p7, 1, 0 }
  0x46   : > { %s688_s19 = sshll.u32 %s258_s12, 3  ;;  %s1215_s11 = scalar_lea.hbm %s1330_s0, %s689_s14 }
  0x47   : > { %s262_s22 = scalar_lea.vmem [#allocation2], %s688_s19  ;;  %p1219_p11 = pnand %p830_p9, %p40_p3 }
  0x48   : > { %s269_s23 = sshll.u32 %s262_s22, 4  ;;  %s259_s10 = scalar_lea.sflag [#allocation3], %s258_s12  ;;  %s1217_s23 = int_to_ptr.vmem [resolvable:$true] %s269_s23 }
  0x49   : > { %s931_s15 = scalar_lea.hbm %s1215_s11, 128  ;;  %p933_p0 = pneg %p1219_p11 }
  0x4a   : > { %p932_p12 = scmp.ne.s32.totalorder %s1215_s11, %s931_s15  ;;  %s936_s14 = scalar_lea.hbm %s1330_s0, 256 }
  0x4b   : > { %p937_p13 = scmp.lt.u32.totalorder %s1215_s11, %s1330_s0  ;;  %p938_p6 = scmp.lt.u32.totalorder %s936_s14, %s931_s15 }
  0x4c   : > { %p934_p2 = pnand %p933_p0, %p932_p12  ;;  %p940_p3 = scmp.lt.u32.totalorder %s931_s15, %s1215_s11 }
  0x4d   : > { %p939_p10 = por %p938_p6, %p937_p13 }
  0x4e   : > { %p935_p1 = pneg %p934_p2 }
  0x4f   : > { %p941_p5 = por %p940_p3, %p939_p10 }
  0x51   : > { %p942_p9 = pnand %p941_p5, %p935_p1 }
  0x53   : > { %945 = shalt.err (!%p942_p9)
}
  0x54   : > { %s946_s12 = scalar_lea.vmem %s1217_s23, 128  ;;  %s1039_s22 = smov [#allocation2]  }
  0x55   : > { %p947_p12 = scmp.ne.s32.totalorder %s1217_s23, %s946_s12  ;;  %s951_s16 = sshll.u32 %s1039_s22, 4  ;;  %s952_s16 = int_to_ptr.vmem [resolvable:$false] %s951_s16 }
  0x56   : > { %s953_s19 = scalar_lea.vmem %s952_s16, 256  ;;  %p954_p4 = scmp.lt.s32.totalorder %s1217_s23, %s952_s16 }
  0x57   : > { %p949_p2 = pnand %p947_p12, %p933_p0  ;;  %p955_p13 = scmp.lt.s32.totalorder %s953_s19, %s946_s12 }
  0x59   : > { %p950_p7 = pneg %p949_p2  ;;  %p956_p6 = por %p955_p13, %p954_p4 }
  0x5b   : > { %p957_p10 = pnand %p956_p6, %p950_p7 }
  0x5d   : > { %960 = shalt.err (!%p957_p10)
}
  0x5e   : > { %823 = dma.hbm_to_vmem [thread:$0]  (!%p1219_p11), %s1215_s11, 128, %s1217_s23, %s259_s10  }
  0x5f   : > { %278 = sbr.rel (%p1122_p8) target bundleno = 903 (0x387), region = 48  ;;  %s1251_s15 = sand.u32 (!%p1122_p8), 1, %s1023_s25  }
  0x60   : > { %s691_s14 = sshll.u32 (!%p1122_p8), %s1251_s15, 3  ;;  %s281_s20 = scalar_lea.sflag (!%p1122_p8), [#allocation3], %s1251_s15 }
  0x61   : > { %s1257_s21 = scalar_lea.vmem (!%p1122_p8), [#allocation2], %s691_s14  ;;  %p1348_p4 = scmp.ne.s32.totalorder (!%p1122_p8), %s1341_s30, 0 }
  0x66   : > { %1006 = dma.done.wait (%p1348_p4), %s281_s20, 128  }
  0x67   : > { %1008 = vsyncadd (%p1348_p4), %s281_s20, 4294967168  ;;  %p1349_p7 = scmp.eq.s32.totalorder %s1103_s28, 0 }
  0x69   : > { %1010 = dma.done.wait (%p1349_p7), [#allocation6], 8192   ;;  %p1350_p8 = pmov %p1349_p7 }
  0x6a   : > { %v1040_v0 = vmov 0.0   ;;  %v325_v1 = vld [vmem:[#allocation5 + $0x8] sm:$0xff]  ;;  %v327_v2 = vld [vmem:[#allocation5 + $0x18] sm:$0xff]  ;;  %v324_v3 = vld [vmem:[#allocation5] sm:$0xff]  ;;  %s699_s16 = sshll.u32 %s1103_s28, 7  ;;  %s322_s19 = scalar_lea.vmem [#allocation8], %s691_s14 }
  0x6b   : > { %1012 = vsyncadd (%p1350_p8), [#allocation6], 4294959104  ;;  %432 = vmatprep.mubr.f32.mxu0 %v1040_v0  ;;  %v737_v4 = vpack.c.bf16 %v327_v2, %v325_v1  ;;  %v326_v5 = vld [vmem:[#allocation5 + $0x10] sm:$0xff]  ;;  %v329_v6 = vld [vmem:[#allocation5 + $0x28] sm:$0xff]  ;;  %s594_s20 = sshll.u32 %s322_s19, 4  ;;  %s1286_s9 = scalar_lea.hbm %s1337_s7, %s699_s16  ;;  %s1288_s20 = int_to_ptr.vmem [resolvable:$true] %s594_s20 }
  0x6c   : > { %v331_v7 = vld [vmem:[#allocation5 + $0x38] sm:$0xff]  ;;  %v739_v8 = vpack.c.bf16 %v326_v5, %v324_v3  ;;  %v328_v10 = vld [vmem:[#allocation5 + $0x20] sm:$0xff]  ;;  %v330_v11 = vld [vmem:[#allocation5 + $0x30] sm:$0xff]  ;;  %s581_s11 = scalar_lea.sflag [#allocation4], %s1251_s15  ;;  %s961_s23 = scalar_lea.vmem %s1288_s20, 128 }
  0x6d   : > { %v741_v9 = vpack.c.bf16 %v331_v7, %v329_v6  ;;  %v333_v12 = vld [vmem:[#allocation5 + $0x48] sm:$0xff]  ;;  %738 = vmatprep.subr.bf16.mxu0 %v737_v4  ;;  %v335_v13 = vld [vmem:[#allocation5 + $0x58] sm:$0xff]  ;;  %v743_v14 = vpack.c.bf16 %v330_v11, %v328_v10  ;;  %v332_v16 = vld [vmem:[#allocation5 + $0x40] sm:$0xff]  ;;  %p962_p11 = scmp.ne.s32.totalorder %s1288_s20, %s961_s23  ;;  %p1351_p0 = scmp.ne.s32.totalorder %s1346_s18, 0 }
  0x6e   : > { %740 = vmatpush1.bf16.msra.mxu0 %v739_v8  ;;  %v745_v15 = vpack.c.bf16 %v335_v13, %v333_v12  ;;  %v334_v17 = vld [vmem:[#allocation5 + $0x50] sm:$0xff]  ;;  %v337_v18 = vld [vmem:[#allocation5 + $0x68] sm:$0xff]  ;;  %v339_v19 = vld [vmem:[#allocation5 + $0x78] sm:$0xff]  ;;  %s1041_s28 = smov [#allocation8]  }
  0x6f   : > { %742 = vmatprep.subr.bf16.mxu0 %v741_v9  ;;  %v747_v20 = vpack.c.bf16 %v334_v17, %v332_v16  ;;  %v749_v21 = vpack.c.bf16 %v339_v19, %v337_v18  ;;  %v336_v22 = vld [vmem:[#allocation5 + $0x60] sm:$0xff]  ;;  %v338_v23 = vld [vmem:[#allocation5 + $0x70] sm:$0xff]  ;;  %v341_v24 = vld [vmem:[#allocation5 + $0x88] sm:$0xff]  ;;  %p963_p1 = pnand %p962_p11, %p1351_p0  ;;  %s965_s14 = sshll.u32 %s1041_s28, 4  ;;  %s966_s14 = int_to_ptr.vmem [resolvable:$false] %s965_s14 }
  0x70   : > { %v343_v25 = vld [vmem:[#allocation5 + $0x98] sm:$0xff]  ;;  %v340_v26 = vld [vmem:[#allocation5 + $0x80] sm:$0xff]  ;;  %v342_v27 = vld [vmem:[#allocation5 + $0x90] sm:$0xff]  ;;  %v751_v31 = vpack.c.bf16 %v338_v23, %v336_v22  ;;  %s967_s29 = scalar_lea.vmem %s966_s14, 256  ;;  %p968_p5 = scmp.lt.s32.totalorder %s1288_s20, %s966_s14 }
  0x71   : > { %v457_v28 = vld [vmem:[#allocation7 + $0x80] sm:$0xff]  ;;  %v458_v29 = vld [vmem:[#allocation7 + $0x88] sm:$0xff]  ;;  %v459_v34 = vld [vmem:[#allocation7 + $0x90] sm:$0xff]  ;;  %v753_v36 = vpack.c.bf16 %v343_v25, %v341_v24  ;;  %v755_v46 = vpack.c.bf16 %v342_v27, %v340_v26  ;;  %p964_p3 = pneg %p963_p1  ;;  %p969_p9 = scmp.lt.s32.totalorder %s967_s29, %s961_s23 }
  0x72   : > { %744 = vmatpush1.bf16.msra.mxu0 %v743_v14  ;;  %v441_v30 = vld [vmem:[#allocation7] sm:$0xff]  ;;  %v769_v32 = vpack.c.bf16 %v458_v29, %v457_v28  ;;  %v442_v33 = vld [vmem:[#allocation7 + $0x8] sm:$0xff]  ;;  %v460_v35 = vld [vmem:[#allocation7 + $0x98] sm:$0xff] }
  0x73   : > { %746 = vmatprep.subr.bf16.mxu0 %v745_v15  ;;  %v771_v37 = vpack.c.bf16 %v442_v33, %v441_v30  ;;  %v773_v38 = vpack.c.bf16 %v460_v35, %v459_v34  ;;  %v443_v39 = vld [vmem:[#allocation7 + $0x10] sm:$0xff]  ;;  %v444_v40 = vld [vmem:[#allocation7 + $0x18] sm:$0xff]  ;;  %v461_v41 = vld [vmem:[#allocation7 + $0xa0] sm:$0xff]  ;;  %v358_v34 = vlaneseq  ;;  %p970_p12 = por %p969_p9, %p968_p5 }
  0x74   : > { %v345_v42 = vld [vmem:[#allocation5 + $0xa8] sm:$0xff]  ;;  %v347_v43 = vld [vmem:[#allocation5 + $0xb8] sm:$0xff]  ;;  %770 = vmatprep.subr.bf16.mxu1 %v769_v32  ;;  %v775_v45 = vpack.c.bf16 %v444_v40, %v443_v39  ;;  %v344_v47 = vld [vmem:[#allocation5 + $0xa0] sm:$0xff] }
  0x75   : > { %v462_v44 = vld [vmem:[#allocation7 + $0xa8] sm:$0xff]  ;;  %772 = vmatpush3.bf16.msra.mxu1 %v771_v37  ;;  %v445_v49 = vld [vmem:[#allocation7 + $0x20] sm:$0xff]  ;;  %v757_v51 = vpack.c.bf16 %v347_v43, %v345_v42  ;;  %v346_v52 = vld [vmem:[#allocation5 + $0xb0] sm:$0xff]  ;;  %v359_v35 = vshrl.u32 %v358_v34, 7  ;;  %p971_p2 = pnand %p970_p12, %p964_p3 }
  0x76   : > { %748 = vmatpush1.bf16.msra.mxu0 %v747_v20  ;;  %774 = vmatprep.subr.bf16.mxu1 %v773_v38  ;;  %v777_v48 = vpack.c.bf16 %v462_v44, %v461_v41  ;;  %v446_v50 = vld [vmem:[#allocation7 + $0x28] sm:$0xff]  ;;  %v463_v53 = vld [vmem:[#allocation7 + $0xb0] sm:$0xff]  ;;  %v464_v54 = vld [vmem:[#allocation7 + $0xb8] sm:$0xff]  ;;  %v759_v58 = vpack.c.bf16 %v346_v52, %v344_v47 }
  0x77   : > { %750 = vmatprep.subr.bf16.mxu0 %v749_v21  ;;  %v349_v55 = vld [vmem:[#allocation5 + $0xc8] sm:$0xff]  ;;  %v351_v56 = vld [vmem:[#allocation5 + $0xd8] sm:$0xff]  ;;  %v779_v57 = vpack.c.bf16 %v446_v50, %v445_v49  ;;  %v348_v59 = vld [vmem:[#allocation5 + $0xc0] sm:$0xff]  ;;  %v781_v60 = vpack.c.bf16 %v464_v54, %v463_v53  ;;  %v364_v38 = vsub.s32 1, %v359_v35 }
  0x78   : > { %v447_v61 = vld [vmem:[#allocation7 + $0x30] sm:$0xff]  ;;  %v448_v62 = vld [vmem:[#allocation7 + $0x38] sm:$0xff]  ;;  %v761_v63 = vpack.c.bf16 %v351_v56, %v349_v55  ;;  %v465_v1 = vld [vmem:[#allocation7 + $0xc0] sm:$0xff] }
  0x79   : > { %776 = vmatpush3.bf16.msra.mxu1 %v775_v45  ;;  %v350_v0 = vld [vmem:[#allocation5 + $0xd0] sm:$0xff]  ;;  %v466_v2 = vld [vmem:[#allocation7 + $0xc8] sm:$0xff]  ;;  %v355_v4 = vld [vmem:[#allocation5 + $0xf8] sm:$0xff]  ;;  %v783_v5 = vpack.c.bf16 %v448_v62, %v447_v61 }
  0x7a   : > { %752 = vmatpush1.bf16.msra.mxu0 %v751_v31  ;;  %778 = vmatprep.subr.bf16.mxu1 %v777_v48  ;;  %v353_v3 = vld [vmem:[#allocation5 + $0xe8] sm:$0xff]  ;;  %v763_v6 = vpack.c.bf16 %v350_v0, %v348_v59  ;;  %v352_v7 = vld [vmem:[#allocation5 + $0xe0] sm:$0xff]  ;;  %v785_v8 = vpack.c.bf16 %v466_v2, %v465_v1  ;;  %v354_v12 = vld [vmem:[#allocation5 + $0xf0] sm:$0xff] }
  0x7b   : > { %754 = vmatprep.subr.bf16.mxu0 %v753_v36  ;;  %v449_v9 = vld [vmem:[#allocation7 + $0x40] sm:$0xff]  ;;  %v450_v10 = vld [vmem:[#allocation7 + $0x48] sm:$0xff]  ;;  %v765_v11 = vpack.c.bf16 %v355_v4, %v353_v3  ;;  %v467_v13 = vld [vmem:[#allocation7 + $0xd0] sm:$0xff]  ;;  %v767_v16 = vpack.c.bf16 %v354_v12, %v352_v7  ;;  %v360_v36 = vsub.s32 0, %v359_v35 }
  0x7c   : > { %v468_v14 = vld [vmem:[#allocation7 + $0xd8] sm:$0xff]  ;;  %v787_v15 = vpack.c.bf16 %v450_v10, %v449_v9  ;;  %v451_v18 = vld [vmem:[#allocation7 + $0x50] sm:$0xff]  ;;  %v469_v20 = vld [vmem:[#allocation7 + $0xe0] sm:$0xff] }
  0x7d   : > { %780 = vmatpush3.bf16.msra.mxu1 %v779_v57  ;;  %v789_v17 = vpack.c.bf16 %v468_v14, %v467_v13  ;;  %v452_v19 = vld [vmem:[#allocation7 + $0x58] sm:$0xff]  ;;  %v470_v21 = vld [vmem:[#allocation7 + $0xe8] sm:$0xff]  ;;  %v453_v25 = vld [vmem:[#allocation7 + $0x60] sm:$0xff] }
  0x7e   : > { %756 = vmatpush1.bf16.msra.mxu0 %v755_v46  ;;  %782 = vmatprep.subr.bf16.mxu1 %v781_v60  ;;  %v791_v22 = vpack.c.bf16 %v452_v19, %v451_v18  ;;  %v323_v23 = vld [vmem:[%s1257_s21] sm:$0xff]  ;;  %v793_v24 = vpack.c.bf16 %v470_v21, %v469_v20  ;;  %v454_v26 = vld [vmem:[#allocation7 + $0x68] sm:$0xff] }
  0x7f   : > { %758 = vmatprep.subr.bf16.mxu0 %v757_v51  ;;  %v795_v27 = vpack.c.bf16 %v454_v26, %v453_v25  ;;  %v471_v28 = vld [vmem:[#allocation7 + $0xf0] sm:$0xff]  ;;  %v472_v29 = vld [vmem:[#allocation7 + $0xf8] sm:$0xff] }
  0x80   : > { %v797_v30 = vpack.c.bf16 %v472_v29, %v471_v28  ;;  %v455_v31 = vld [vmem:[#allocation7 + $0x70] sm:$0xff]  ;;  %v456_v32 = vld [vmem:[#allocation7 + $0x78] sm:$0xff] }
  0x81   : > { %784 = vmatpush3.bf16.msra.mxu1 %v783_v5  ;;  %v799_v33 = vpack.c.bf16 %v456_v32, %v455_v31  ;;  %v356_v37 = vld [vmem:[%s1332_s2] sm:$0x3] }
  0x82   : > { %760 = vmatpush1.bf16.msra.mxu0 %v759_v58  ;;  %786 = vmatprep.subr.bf16.mxu1 %v785_v8  ;;  %v361_v39 = vrot.slane %v356_v37, %v360_v36  ;;  %v365_v40 = vrot.slane %v356_v37, %v364_v38  ;;  %v695_v48 = vld [vmem:[%s1334_s4] ss:$0 sm:$0xff] }
  0x83   : > { %762 = vmatprep.subr.bf16.mxu0 %v761_v63  ;;  %v696_v61 = vld [vmem:[%s1335_s5] ss:$0 sm:$0xff] }
  0x84   : > { %v697_v63 = vld [vmem:[%s1336_s6] ss:$0 sm:$0xff] }
  0x85   : > { %788 = vmatpush3.bf16.msra.mxu1 %v787_v15 }
  0x86   : > { %764 = vmatpush1.bf16.msra.mxu0 %v763_v6  ;;  %790 = vmatprep.subr.bf16.mxu1 %v789_v17 }
  0x87   : > { %766 = vmatprep.subr.bf16.mxu0 %v765_v11 }
  0x89   : > { %792 = vmatpush3.bf16.msra.mxu1 %v791_v22 }
  0x8a   : > { %768 = vmatpush1.bf16.msra.mxu0 %v767_v16  ;;  %794 = vmatprep.subr.bf16.mxu1 %v793_v24 }
  0x8d   : > { %433 = vmatmul.mubr.f32.vlgmr.msra.gmra.mrb[0].mxu0 %v323_v23  ;;  %796 = vmatpush3.bf16.msra.mxu1 %v795_v27 }
  0x8e   : > { %798 = vmatprep.subr.bf16.mxu1 %v797_v30 }
  0x91   : > { %800 = vmatpush3.bf16.msra.mxu1 %v799_v33 }
 0x160   : > { %v434_v41 = vpop.f32.mrb[0].mxu0 }
 0x161   : > { %v435_v42 = vadd.f32 %v434_v41, %v361_v39  ;;  %v436_v43 = vpop.f32.mrb[1].mxu0 }
 0x162   : > { %v437_v44 = vadd.f32 %v436_v43, %v365_v40 }
 0x163   : > { %v439_v46 = vmax.f32 %v435_v42, 0.0 }
 0x164   : > { %v440_v45 = vmax.f32 %v437_v44, 0.0 }
 0x166   : > { %544 = vmatprep.mubr.f32.mxu1 %v440_v45 }
 0x167   : > { %545 = vmatmul.mubr.f32.vlgmr.msra.gmra.mrb[0].mxu1 %v439_v46 }
 0x23a   : > { %v734_v47 = vpop.f32.mrb[0].mxu1 }
 0x23b   : > { %v735_v49 = vpop.f32.mrb[1].mxu1 }
 0x23c   : > { %v736_v50 = vadd.f32 %v735_v49, %v734_v47 }
 0x23e   : > { %v547_v51 = vadd.f32 %v736_v50, %v695_v48 }
 0x240   : > { %v550_v52 = vadd.f32 %v547_v51, %v323_v23 }
 0x242   : > { %551 = vadd.xlane.f32.xlu0 %v550_v52 }
 0x2cf   : > { %v552_v53 = vpop.xlane.xlu0 %551 }
 0x2d0   : > { %v554_v54 = vmul.f32 0.0078125, %v552_v53 }
 0x2d2   : > { %v555_v55 = vsub.f32 %v550_v52, %v554_v54 }
 0x2d4   : > { %v556_v56 = vmul.f32 %v555_v55, %v555_v55 }
 0x2d6   : > { %557 = vadd.xlane.f32.xlu0 %v556_v56 }
 0x363   : > { %v558_v57 = vpop.xlane.xlu0 %557 }
 0x364   : > { %v559_v58 = vmul.f32 0.0078125, %v558_v57 }
 0x366   : > { %v560_v59 = vadd.f32 1e-05, %v559_v58 }
 0x368   : > { %873 = vrsqrt.f32 %v560_v59 }
 0x372   : > { %v874_v60 = vpop.eup %873 }
 0x373   : > { %v562_v62 = vmul.f32 %v874_v60, %v555_v55 }
 0x375   : > { %v570_v0 = vmul.f32 %v696_v61, %v562_v62 }
 0x377   : > { %v578_v1 = vadd.f32 %v697_v63, %v570_v0 }
 0x379   : > { %579 = vst [vmem:[%s322_s19] sm:$0xff] %v578_v1 }
 0x37a   : > { %974 = shalt.err (!%p971_p2)
}
 0x37b   : > { %s975_s15 = scalar_lea.hbm %s1286_s9, 128  ;;  %s979_s22 = scalar_lea.hbm %s1337_s7, 256 }
 0x37c   : > { %p976_p13 = scmp.ne.s32.totalorder %s1286_s9, %s975_s15  ;;  %p980_p4 = scmp.lt.u32.totalorder %s1286_s9, %s1337_s7 }
 0x37d   : > { %p981_p7 = scmp.lt.u32.totalorder %s979_s22, %s975_s15  ;;  %p983_p11 = scmp.lt.u32.totalorder %s975_s15, %s1286_s9 }
 0x37e   : > { %p977_p6 = pnand %p976_p13, %p1351_p0 }
 0x37f   : > { %p982_p8 = por %p981_p7, %p980_p4 }
 0x380   : > { %p978_p10 = pneg %p977_p6 }
 0x381   : > { %p984_p1 = por %p983_p11, %p982_p8 }
 0x383   : > { %p985_p3 = pnand %p984_p1, %p978_p10 }
 0x385   : > { %988 = shalt.err (!%p985_p3)
}
 0x386   : > { %811 = dma.vmem_to_hbm [thread:$0]  (%p1351_p0), %s1288_s20, 128, %s1286_s9, %s581_s11  }
 0x387 PF: > { %s606_s21 = sand.u32 1, %s1019_s24   ;;  %p1352_p5 = scmp.ne.s32.totalorder %s1342_s8, 0 }
 0x388   : > { %p1353_p9 = scmp.ge.s32.totalorder %s1031_s27, 2  ;;  %s607_s30 = scalar_lea.sflag [#allocation4], %s606_s21 }
 0x38a   : > { %p825_p12 = pnand %p1353_p9, %p1352_p5 }
 0x38c   : > { %1014 = dma.done.wait (!%p825_p12), %s607_s30, 128  }
 0x38d   : > { %1016 = vsyncadd (!%p825_p12), %s607_s30, 4294967168  ;;  %p21_p2 = scmp.ge.s32.totalorder %s1192_s13, 4   ;;  %s1354_s24 = smov %s1023_s25 }
 0x38e   : > { %s1355_s25 = smov %s1027_s26  ;;  %s1356_s26 = smov %s1201_s17 }
 0x38f   : > { %s1357_s27 = smov %s1192_s13  ;;  %23 = sbr.rel (!%p21_p2) target bundleno = 6 (0x6), region = 101 }
 0x396   :  { %612 = vsyncpa [#allocation3], 1 }
 0x397   :  { %614 = vsyncpa [#allocation3 + $0x1], 1 }
 0x398   :  { %615 = vsyncpa [#allocation6], 1 }
 0x399   :  { %616 = vsyncpa [#allocation4], 1 }
 0x39a   :  { %618 = vsyncpa [#allocation4 + $0x1], 1 }

</bundles_post_ra>
